<compile_context>
chip_gen: v6e
topology: v6e:2x2x1
jax: 0.10.0
libtpu: 0.0.40
codegen_flags: <defaults>
</compile_context>

<pallas_src>
import jax
import jax.numpy as jnp
from jax.experimental import pallas as pl
from jax.experimental.pallas import tpu as pltpu  # noqa: F401  (TPU backend)


def _conv2d_valid_kernel(x_ref, w_ref, o_ref):
    """Direct (valid) stride-1 2-D convolution, NCHW in / NCHW out.

    x_ref: (N, C, H, W)         float32, VMEM
    w_ref: (KH*KW, O, C, 1, 1)  float32, VMEM (pre-packed at model init)
    o_ref: (N, O, OH, OW)       VMEM, OH = H-KH+1, OW = W-KW+1
    """
    _, _, H, W = x_ref.shape
    _, _, OH, OW = o_ref.shape
    KH = H - OH + 1
    KW = W - OW + 1

    # Hoisted: load once, cast once (no-op for f32 inputs). Weights are already f32.
    x = x_ref[...].astype(jnp.float32)   # (N, C, H, W)
    w = w_ref[...]                       # (KH*KW, O, C, 1, 1)

    # One partial accumulator per kernel row -> independent add chains (ILP),
    # combined once at the end.
    row_accs = []
    for kh in range(KH):
        acc = None
        for kw in range(KW):
            # All input channels at once: C is a major axis -> plain vreg
            # selection, no lane-masked selects.
            patch = x[:, :, kh:kh + OH, kw:kw + OW]                 # (N, C, OH, OW)
            tap = w[kh * KW + kw]                                    # (O, C, 1, 1)
            # Per-tap contraction over C: broadcast-MAC on the VPU + reduction
            # over the (major) C axis.  9 of these total.
            prod = patch[:, None, :, :, :] * tap[None, :, :, :, :]   # (N, O, C, OH, OW)
            contrib = jnp.sum(prod, axis=2)                          # (N, O, OH, OW)
            acc = contrib if acc is None else acc + contrib
        row_accs.append(acc)

    out = row_accs[0]
    for a in row_accs[1:]:
        out = out + a
    o_ref[...] = out.astype(o_ref.dtype)


def conv2d_nchw(x_nchw, w_packed):
    """F.conv2d(x, weight, bias=None), stride=1, padding=0. NCHW in / NCHW out."""
    N, C, H, W = x_nchw.shape
    KHKW, O, _, _, _ = w_packed.shape
    KH = KW = int(round(KHKW ** 0.5))      # square kernel (3x3 here)
    OH = H - KH + 1
    OW = W - KW + 1

    return pl.pallas_call(
        _conv2d_valid_kernel,
        out_shape=jax.ShapeDtypeStruct((N, O, OH, OW), x_nchw.dtype),
        in_specs=[
            pl.BlockSpec((N, C, H, W), lambda: (0, 0, 0, 0)),
            pl.BlockSpec((KHKW, O, C, 1, 1), lambda: (0, 0, 0, 0, 0)),
        ],
        out_specs=pl.BlockSpec((N, O, OH, OW), lambda: (0, 0, 0, 0)),
        grid=(),
    )(x_nchw, w_packed)


def pack_conv_weight(w_oihw):
    """OIHW -> (KH*KW, O, C, 1, 1) float32.  Done once at init, not per call."""
    O, C, KH, KW = w_oihw.shape
    w = jnp.transpose(w_oihw, (2, 3, 0, 1)).reshape(KH * KW, O, C)
    return w[..., None, None].astype(jnp.float32)


class Model:
    """JAX mirror of the PyTorch Model: a single bias-free 3x3 conv, 3->3 channels."""

    def __init__(self, key):
        # Conv2d(3, 3, 3) weight shape: (out_ch=3, in_ch=3, kh=3, kw=3).
        fan_in = 3 * 3 * 3
        bound = 1.0 / (fan_in ** 0.5)
        self.weight = jax.random.uniform(
            key, (3, 3, 3, 3), dtype=jnp.float32, minval=-bound, maxval=bound
        )  # OIHW, kept for the reference check
        self.w_packed = pack_conv_weight(self.weight)

    def __call__(self, x):
        return conv2d_nchw(x, self.w_packed)


if __name__ == "__main__":
    key = jax.random.PRNGKey(0)
    kx, kw = jax.random.split(key)

    # Matches the reference script: x = torch.randn(2, 3, 5, 5)
    x = jax.random.normal(kx, (2, 3, 5, 5), dtype=jnp.float32)

    model = Model(kw)
    out = model(x)
    out = jax.block_until_ready(out)

    # Sanity check against XLA's reference convolution (NCHW / OIHW).
    ref = jax.lax.conv_general_dilated(
        x, model.weight,
        window_strides=(1, 1), padding="VALID",
        dimension_numbers=("NCHW", "OIHW", "NCHW"),
    )
    assert out.shape == (2, 3, 3, 3), out.shape
    assert jnp.allclose(out, ref, atol=1e-5, rtol=1e-5), "mismatch vs lax conv"

    print("KERNEL_OK")
</pallas_src>

<mosaic_0001>
module attributes {stable_mosaic.version = 11 : i64} {
  func.func @_conv2d_valid_kernel(%arg0: memref<2x3x5x5xf32, #tpu.memory_space<vmem>>, %arg1: memref<9x3x3x1x1xf32, #tpu.memory_space<vmem>>, %arg2: memref<2x3x3x3xf32, #tpu.memory_space<vmem>>) attributes {dimension_semantics = [], scalar_prefetch = 0 : i64, scratch_operands = 0 : i64, tpu.core_type = #tpu.core_type<tc>} {
    %c0 = arith.constant 0 : index
    %c0_0 = arith.constant 0 : index
    %c0_1 = arith.constant 0 : index
    %c0_2 = arith.constant 0 : index
    %0 = vector.load %arg0[%c0, %c0_0, %c0_1, %c0_2] : memref<2x3x5x5xf32, #tpu.memory_space<vmem>>, vector<2x3x5x5xf32>
    %c0_3 = arith.constant 0 : index
    %c0_4 = arith.constant 0 : index
    %c0_5 = arith.constant 0 : index
    %c0_6 = arith.constant 0 : index
    %c0_7 = arith.constant 0 : index
    %1 = vector.load %arg1[%c0_3, %c0_4, %c0_5, %c0_6, %c0_7] : memref<9x3x3x1x1xf32, #tpu.memory_space<vmem>>, vector<9x3x3x1x1xf32>
    %2 = vector.extract_strided_slice %0 {offsets = [0, 0, 0, 0], sizes = [2, 3, 3, 3], strides = [1, 1, 1, 1]} : vector<2x3x5x5xf32> to vector<2x3x3x3xf32>
    %3 = vector.extract_strided_slice %1 {offsets = [0, 0, 0, 0, 0], sizes = [1, 3, 3, 1, 1], strides = [1, 1, 1, 1, 1]} : vector<9x3x3x1x1xf32> to vector<1x3x3x1x1xf32>
    %4 = vector.shape_cast %3 : vector<1x3x3x1x1xf32> to vector<3x3x1x1xf32>
    %5 = vector.shape_cast %2 : vector<2x3x3x3xf32> to vector<2x1x3x3x3xf32>
    %6 = vector.shape_cast %4 : vector<3x3x1x1xf32> to vector<1x3x3x1x1xf32>
    %7 = vector.broadcast %5 : vector<2x1x3x3x3xf32> to vector<2x3x3x3x3xf32>
    %8 = vector.broadcast %6 : vector<1x3x3x1x1xf32> to vector<2x3x3x3x3xf32>
    %9 = arith.mulf %7, %8 : vector<2x3x3x3x3xf32>
    %cst = arith.constant dense<0.000000e+00> : vector<2x3x3x3xf32>
    %10 = vector.multi_reduction <add>, %9, %cst [2] : vector<2x3x3x3x3xf32> to vector<2x3x3x3xf32>
    %11 = vector.extract_strided_slice %0 {offsets = [0, 0, 0, 1], sizes = [2, 3, 3, 3], strides = [1, 1, 1, 1]} : vector<2x3x5x5xf32> to vector<2x3x3x3xf32>
    %12 = vector.extract_strided_slice %1 {offsets = [1, 0, 0, 0, 0], sizes = [1, 3, 3, 1, 1], strides = [1, 1, 1, 1, 1]} : vector<9x3x3x1x1xf32> to vector<1x3x3x1x1xf32>
    %13 = vector.shape_cast %12 : vector<1x3x3x1x1xf32> to vector<3x3x1x1xf32>
    %14 = vector.shape_cast %11 : vector<2x3x3x3xf32> to vector<2x1x3x3x3xf32>
    %15 = vector.shape_cast %13 : vector<3x3x1x1xf32> to vector<1x3x3x1x1xf32>
    %16 = vector.broadcast %14 : vector<2x1x3x3x3xf32> to vector<2x3x3x3x3xf32>
    %17 = vector.broadcast %15 : vector<1x3x3x1x1xf32> to vector<2x3x3x3x3xf32>
    %18 = arith.mulf %16, %17 : vector<2x3x3x3x3xf32>
    %cst_8 = arith.constant dense<0.000000e+00> : vector<2x3x3x3xf32>
    %19 = vector.multi_reduction <add>, %18, %cst_8 [2] : vector<2x3x3x3x3xf32> to vector<2x3x3x3xf32>
    %20 = arith.addf %10, %19 : vector<2x3x3x3xf32>
    %21 = vector.extract_strided_slice %0 {offsets = [0, 0, 0, 2], sizes = [2, 3, 3, 3], strides = [1, 1, 1, 1]} : vector<2x3x5x5xf32> to vector<2x3x3x3xf32>
    %22 = vector.extract_strided_slice %1 {offsets = [2, 0, 0, 0, 0], sizes = [1, 3, 3, 1, 1], strides = [1, 1, 1, 1, 1]} : vector<9x3x3x1x1xf32> to vector<1x3x3x1x1xf32>
    %23 = vector.shape_cast %22 : vector<1x3x3x1x1xf32> to vector<3x3x1x1xf32>
    %24 = vector.shape_cast %21 : vector<2x3x3x3xf32> to vector<2x1x3x3x3xf32>
    %25 = vector.shape_cast %23 : vector<3x3x1x1xf32> to vector<1x3x3x1x1xf32>
    %26 = vector.broadcast %24 : vector<2x1x3x3x3xf32> to vector<2x3x3x3x3xf32>
    %27 = vector.broadcast %25 : vector<1x3x3x1x1xf32> to vector<2x3x3x3x3xf32>
    %28 = arith.mulf %26, %27 : vector<2x3x3x3x3xf32>
    %cst_9 = arith.constant dense<0.000000e+00> : vector<2x3x3x3xf32>
    %29 = vector.multi_reduction <add>, %28, %cst_9 [2] : vector<2x3x3x3x3xf32> to vector<2x3x3x3xf32>
    %30 = arith.addf %20, %29 : vector<2x3x3x3xf32>
    %31 = vector.extract_strided_slice %0 {offsets = [0, 0, 1, 0], sizes = [2, 3, 3, 3], strides = [1, 1, 1, 1]} : vector<2x3x5x5xf32> to vector<2x3x3x3xf32>
    %32 = vector.extract_strided_slice %1 {offsets = [3, 0, 0, 0, 0], sizes = [1, 3, 3, 1, 1], strides = [1, 1, 1, 1, 1]} : vector<9x3x3x1x1xf32> to vector<1x3x3x1x1xf32>
    %33 = vector.shape_cast %32 : vector<1x3x3x1x1xf32> to vector<3x3x1x1xf32>
    %34 = vector.shape_cast %31 : vector<2x3x3x3xf32> to vector<2x1x3x3x3xf32>
    %35 = vector.shape_cast %33 : vector<3x3x1x1xf32> to vector<1x3x3x1x1xf32>
    %36 = vector.broadcast %34 : vector<2x1x3x3x3xf32> to vector<2x3x3x3x3xf32>
    %37 = vector.broadcast %35 : vector<1x3x3x1x1xf32> to vector<2x3x3x3x3xf32>
    %38 = arith.mulf %36, %37 : vector<2x3x3x3x3xf32>
    %cst_10 = arith.constant dense<0.000000e+00> : vector<2x3x3x3xf32>
    %39 = vector.multi_reduction <add>, %38, %cst_10 [2] : vector<2x3x3x3x3xf32> to vector<2x3x3x3xf32>
    %40 = vector.extract_strided_slice %0 {offsets = [0, 0, 1, 1], sizes = [2, 3, 3, 3], strides = [1, 1, 1, 1]} : vector<2x3x5x5xf32> to vector<2x3x3x3xf32>
    %41 = vector.extract_strided_slice %1 {offsets = [4, 0, 0, 0, 0], sizes = [1, 3, 3, 1, 1], strides = [1, 1, 1, 1, 1]} : vector<9x3x3x1x1xf32> to vector<1x3x3x1x1xf32>
    %42 = vector.shape_cast %41 : vector<1x3x3x1x1xf32> to vector<3x3x1x1xf32>
    %43 = vector.shape_cast %40 : vector<2x3x3x3xf32> to vector<2x1x3x3x3xf32>
    %44 = vector.shape_cast %42 : vector<3x3x1x1xf32> to vector<1x3x3x1x1xf32>
    %45 = vector.broadcast %43 : vector<2x1x3x3x3xf32> to vector<2x3x3x3x3xf32>
    %46 = vector.broadcast %44 : vector<1x3x3x1x1xf32> to vector<2x3x3x3x3xf32>
    %47 = arith.mulf %45, %46 : vector<2x3x3x3x3xf32>
    %cst_11 = arith.constant dense<0.000000e+00> : vector<2x3x3x3xf32>
    %48 = vector.multi_reduction <add>, %47, %cst_11 [2] : vector<2x3x3x3x3xf32> to vector<2x3x3x3xf32>
    %49 = arith.addf %39, %48 : vector<2x3x3x3xf32>
    %50 = vector.extract_strided_slice %0 {offsets = [0, 0, 1, 2], sizes = [2, 3, 3, 3], strides = [1, 1, 1, 1]} : vector<2x3x5x5xf32> to vector<2x3x3x3xf32>
    %51 = vector.extract_strided_slice %1 {offsets = [5, 0, 0, 0, 0], sizes = [1, 3, 3, 1, 1], strides = [1, 1, 1, 1, 1]} : vector<9x3x3x1x1xf32> to vector<1x3x3x1x1xf32>
    %52 = vector.shape_cast %51 : vector<1x3x3x1x1xf32> to vector<3x3x1x1xf32>
    %53 = vector.shape_cast %50 : vector<2x3x3x3xf32> to vector<2x1x3x3x3xf32>
    %54 = vector.shape_cast %52 : vector<3x3x1x1xf32> to vector<1x3x3x1x1xf32>
    %55 = vector.broadcast %53 : vector<2x1x3x3x3xf32> to vector<2x3x3x3x3xf32>
    %56 = vector.broadcast %54 : vector<1x3x3x1x1xf32> to vector<2x3x3x3x3xf32>
    %57 = arith.mulf %55, %56 : vector<2x3x3x3x3xf32>
    %cst_12 = arith.constant dense<0.000000e+00> : vector<2x3x3x3xf32>
    %58 = vector.multi_reduction <add>, %57, %cst_12 [2] : vector<2x3x3x3x3xf32> to vector<2x3x3x3xf32>
    %59 = arith.addf %49, %58 : vector<2x3x3x3xf32>
    %60 = vector.extract_strided_slice %0 {offsets = [0, 0, 2, 0], sizes = [2, 3, 3, 3], strides = [1, 1, 1, 1]} : vector<2x3x5x5xf32> to vector<2x3x3x3xf32>
    %61 = vector.extract_strided_slice %1 {offsets = [6, 0, 0, 0, 0], sizes = [1, 3, 3, 1, 1], strides = [1, 1, 1, 1, 1]} : vector<9x3x3x1x1xf32> to vector<1x3x3x1x1xf32>
    %62 = vector.shape_cast %61 : vector<1x3x3x1x1xf32> to vector<3x3x1x1xf32>
    %63 = vector.shape_cast %60 : vector<2x3x3x3xf32> to vector<2x1x3x3x3xf32>
    %64 = vector.shape_cast %62 : vector<3x3x1x1xf32> to vector<1x3x3x1x1xf32>
    %65 = vector.broadcast %63 : vector<2x1x3x3x3xf32> to vector<2x3x3x3x3xf32>
    %66 = vector.broadcast %64 : vector<1x3x3x1x1xf32> to vector<2x3x3x3x3xf32>
    %67 = arith.mulf %65, %66 : vector<2x3x3x3x3xf32>
    %cst_13 = arith.constant dense<0.000000e+00> : vector<2x3x3x3xf32>
    %68 = vector.multi_reduction <add>, %67, %cst_13 [2] : vector<2x3x3x3x3xf32> to vector<2x3x3x3xf32>
    %69 = vector.extract_strided_slice %0 {offsets = [0, 0, 2, 1], sizes = [2, 3, 3, 3], strides = [1, 1, 1, 1]} : vector<2x3x5x5xf32> to vector<2x3x3x3xf32>
    %70 = vector.extract_strided_slice %1 {offsets = [7, 0, 0, 0, 0], sizes = [1, 3, 3, 1, 1], strides = [1, 1, 1, 1, 1]} : vector<9x3x3x1x1xf32> to vector<1x3x3x1x1xf32>
    %71 = vector.shape_cast %70 : vector<1x3x3x1x1xf32> to vector<3x3x1x1xf32>
    %72 = vector.shape_cast %69 : vector<2x3x3x3xf32> to vector<2x1x3x3x3xf32>
    %73 = vector.shape_cast %71 : vector<3x3x1x1xf32> to vector<1x3x3x1x1xf32>
    %74 = vector.broadcast %72 : vector<2x1x3x3x3xf32> to vector<2x3x3x3x3xf32>
    %75 = vector.broadcast %73 : vector<1x3x3x1x1xf32> to vector<2x3x3x3x3xf32>
    %76 = arith.mulf %74, %75 : vector<2x3x3x3x3xf32>
    %cst_14 = arith.constant dense<0.000000e+00> : vector<2x3x3x3xf32>
    %77 = vector.multi_reduction <add>, %76, %cst_14 [2] : vector<2x3x3x3x3xf32> to vector<2x3x3x3xf32>
    %78 = arith.addf %68, %77 : vector<2x3x3x3xf32>
    %79 = vector.extract_strided_slice %0 {offsets = [0, 0, 2, 2], sizes = [2, 3, 3, 3], strides = [1, 1, 1, 1]} : vector<2x3x5x5xf32> to vector<2x3x3x3xf32>
    %80 = vector.extract_strided_slice %1 {offsets = [8, 0, 0, 0, 0], sizes = [1, 3, 3, 1, 1], strides = [1, 1, 1, 1, 1]} : vector<9x3x3x1x1xf32> to vector<1x3x3x1x1xf32>
    %81 = vector.shape_cast %80 : vector<1x3x3x1x1xf32> to vector<3x3x1x1xf32>
    %82 = vector.shape_cast %79 : vector<2x3x3x3xf32> to vector<2x1x3x3x3xf32>
    %83 = vector.shape_cast %81 : vector<3x3x1x1xf32> to vector<1x3x3x1x1xf32>
    %84 = vector.broadcast %82 : vector<2x1x3x3x3xf32> to vector<2x3x3x3x3xf32>
    %85 = vector.broadcast %83 : vector<1x3x3x1x1xf32> to vector<2x3x3x3x3xf32>
    %86 = arith.mulf %84, %85 : vector<2x3x3x3x3xf32>
    %cst_15 = arith.constant dense<0.000000e+00> : vector<2x3x3x3xf32>
    %87 = vector.multi_reduction <add>, %86, %cst_15 [2] : vector<2x3x3x3x3xf32> to vector<2x3x3x3xf32>
    %88 = arith.addf %78, %87 : vector<2x3x3x3xf32>
    %89 = arith.addf %30, %59 : vector<2x3x3x3xf32>
    %90 = arith.addf %89, %88 : vector<2x3x3x3xf32>
    %c0_16 = arith.constant 0 : index
    %c0_17 = arith.constant 0 : index
    %c0_18 = arith.constant 0 : index
    %c0_19 = arith.constant 0 : index
    %91 = vector.load %arg2[%c0_16, %c0_17, %c0_18, %c0_19] : memref<2x3x3x3xf32, #tpu.memory_space<vmem>>, vector<2x3x3x3xf32>
    tpu.vector_store %arg2[%c0_16, %c0_17, %c0_18, %c0_19], %90 {strides = array<i32>} : memref<2x3x3x3xf32, #tpu.memory_space<vmem>>, vector<2x3x3x3xf32>,
    return
  }
}

</mosaic_0001>

<bundles_post_ra>
// kernel: tpu_custom_call.1
= control target key start
LH: loop header
LB: loop body
LE: loop exit
PB: predicated region body
PF: predicated region fallthrough
CT: control target
= control target key end

     0   :  { %v1598_v0 = vmov 0   ;;  %vm327_vm0 = vcmask 26632   ;;  %s1599_s7 = smov 127   ;;  %vm487_vm1 = vcmask 34832   ;;  %s1600_s10 = smov 126   ;;  %vm647_vm2 = vcmask 19457   ;;  %s2438_s1 = inlined_call_operand.vmem [shape: f32[9,3,3,1,1], index: 1, kind: input, shape index: {}]   ;;  %s2439_s0 = inlined_call_operand.vmem [shape: f32[2,3,5,5], index: 0, kind: input, shape index: {}]   ;;  %s2440_s2 = inlined_call_operand.vmem [shape: f32[2,3,3,3], index: 2, kind: output, shape index: {}]  }
   0x1   :  { %1591 = vset.pattern.permute.xlu1 %v1598_v0  ;;  %1590 = vset.pattern.permute.xlu0 %v1598_v0  ;;  %v1508_v1 = vld [vmem:[%s2438_s1 + $0x2] ss:$0 sm:$0xff]  ;;  %v1506_v2 = vld [vmem:[%s2438_s1] ss:$0 sm:$0xff]  ;;  %v1509_v3 = vld [vmem:[%s2438_s1 + $0x3] ss:$0 sm:$0xff] }
   0x2   :  { %152 = vperm.xlu1 %1591, %v1508_v1   ;;  %144 = vperm.xlu0 %1590, %v1506_v2   ;;  %v1507_v4 = vld [vmem:[%s2438_s1 + $0x1] ss:$0 sm:$0xff]  ;;  %v1511_v5 = vld [vmem:[%s2438_s1 + $0x5] ss:$0 sm:$0xff]  ;;  %v1510_v6 = vld [vmem:[%s2438_s1 + $0x4] ss:$0 sm:$0xff] }
   0x3   :  { %v1513_v7 = vld [vmem:[%s2438_s1 + $0x7] ss:$0 sm:$0xff]  ;;  %v1512_v8 = vld [vmem:[%s2438_s1 + $0x6] ss:$0 sm:$0xff]  ;;  %v1515_v9 = vld [vmem:[%s2438_s1 + $0x9] ss:$0 sm:$0xff] }
   0x4   :  { %v1514_v10 = vld [vmem:[%s2438_s1 + $0x8] ss:$0 sm:$0xff]  ;;  %v1517_v11 = vld [vmem:[%s2438_s1 + $0xb] ss:$0 sm:$0xff]  ;;  %v1516_v12 = vld [vmem:[%s2438_s1 + $0xa] ss:$0 sm:$0xff] }
   0x5   :  { %v1519_v13 = vld [vmem:[%s2438_s1 + $0xd] ss:$0 sm:$0xff]  ;;  %v1518_v14 = vld [vmem:[%s2438_s1 + $0xc] ss:$0 sm:$0xff]  ;;  %v1521_v15 = vld [vmem:[%s2438_s1 + $0xf] ss:$0 sm:$0xff] }
   0x6   :  { %156 = vperm.xlu1 %1591, %v1509_v3   ;;  %148 = vperm.xlu0 %1590, %v1507_v4   ;;  %v1520_v16 = vld [vmem:[%s2438_s1 + $0xe] ss:$0 sm:$0xff]  ;;  %v1523_v17 = vld [vmem:[%s2438_s1 + $0x11] ss:$0 sm:$0xff]  ;;  %v1522_v18 = vld [vmem:[%s2438_s1 + $0x10] ss:$0 sm:$0xff] }
   0x7   :  { %v1525_v19 = vld [vmem:[%s2438_s1 + $0x13] ss:$0 sm:$0xff]  ;;  %v1524_v20 = vld [vmem:[%s2438_s1 + $0x12] ss:$0 sm:$0xff]  ;;  %v1527_v21 = vld [vmem:[%s2438_s1 + $0x15] ss:$0 sm:$0xff] }
   0x8   :  { %v1526_v22 = vld [vmem:[%s2438_s1 + $0x14] ss:$0 sm:$0xff]  ;;  %v1529_v23 = vld [vmem:[%s2438_s1 + $0x17] ss:$0 sm:$0xff]  ;;  %v1528_v24 = vld [vmem:[%s2438_s1 + $0x16] ss:$0 sm:$0xff] }
   0x9   :  { %v1531_v25 = vld [vmem:[%s2438_s1 + $0x19] ss:$0 sm:$0xff]  ;;  %v1530_v26 = vld [vmem:[%s2438_s1 + $0x18] ss:$0 sm:$0xff]  ;;  %v1533_v27 = vld [vmem:[%s2438_s1 + $0x1b] ss:$0 sm:$0xff] }
   0xa   :  { %164 = vperm.xlu1 %1591, %v1511_v5   ;;  %160 = vperm.xlu0 %1590, %v1510_v6   ;;  %v1532_v28 = vld [vmem:[%s2438_s1 + $0x1a] ss:$0 sm:$0xff]  ;;  %v1535_v29 = vld [vmem:[%s2438_s1 + $0x1d] ss:$0 sm:$0xff]  ;;  %v1534_v30 = vld [vmem:[%s2438_s1 + $0x1c] ss:$0 sm:$0xff] }
   0xb   :  { %v1537_v31 = vld [vmem:[%s2438_s1 + $0x1f] ss:$0 sm:$0xff]  ;;  %v1536_v32 = vld [vmem:[%s2438_s1 + $0x1e] ss:$0 sm:$0xff]  ;;  %v1539_v33 = vld [vmem:[%s2438_s1 + $0x21] ss:$0 sm:$0xff] }
   0xc   :  { %v1538_v34 = vld [vmem:[%s2438_s1 + $0x20] ss:$0 sm:$0xff]  ;;  %v1541_v35 = vld [vmem:[%s2438_s1 + $0x23] ss:$0 sm:$0xff]  ;;  %v1540_v36 = vld [vmem:[%s2438_s1 + $0x22] ss:$0 sm:$0xff] }
   0xd   :  { %v1543_v37 = vld [vmem:[%s2438_s1 + $0x25] ss:$0 sm:$0xff]  ;;  %v1542_v38 = vld [vmem:[%s2438_s1 + $0x24] ss:$0 sm:$0xff]  ;;  %v1545_v39 = vld [vmem:[%s2438_s1 + $0x27] ss:$0 sm:$0xff] }
   0xe   :  { %172 = vperm.xlu1 %1591, %v1513_v7   ;;  %168 = vperm.xlu0 %1590, %v1512_v8   ;;  %v1544_v40 = vld [vmem:[%s2438_s1 + $0x26] ss:$0 sm:$0xff]  ;;  %v1547_v41 = vld [vmem:[%s2438_s1 + $0x29] ss:$0 sm:$0xff]  ;;  %v1546_v42 = vld [vmem:[%s2438_s1 + $0x28] ss:$0 sm:$0xff] }
   0xf   :  { %v1549_v43 = vld [vmem:[%s2438_s1 + $0x2b] ss:$0 sm:$0xff]  ;;  %v1548_v44 = vld [vmem:[%s2438_s1 + $0x2a] ss:$0 sm:$0xff]  ;;  %v1551_v45 = vld [vmem:[%s2438_s1 + $0x2d] ss:$0 sm:$0xff] }
  0x10   :  { %v1550_v46 = vld [vmem:[%s2438_s1 + $0x2c] ss:$0 sm:$0xff]  ;;  %v1553_v47 = vld [vmem:[%s2438_s1 + $0x2f] ss:$0 sm:$0xff]  ;;  %v1552_v48 = vld [vmem:[%s2438_s1 + $0x2e] ss:$0 sm:$0xff] }
  0x11   :  { %v1555_v49 = vld [vmem:[%s2438_s1 + $0x31] ss:$0 sm:$0xff]  ;;  %v1554_v50 = vld [vmem:[%s2438_s1 + $0x30] ss:$0 sm:$0xff]  ;;  %v1787_v61 = vld [vmem:[%s2439_s0] sm:$0x1f] }
  0x12   :  { %274 = vperm.xlu1 %1591, %v1515_v9   ;;  %176 = vperm.xlu0 %1590, %v1514_v10   ;;  %v1793_v63 = vld [vmem:[%s2439_s0 + $0x10] sm:$0x1f]  ;;  %v1798_v0 = vld [vmem:[%s2439_s0 + $0x8] sm:$0x1f]  ;;  %v1807_v7 = vld [vmem:[%s2439_s0 + $0x20] sm:$0x1f] }
  0x13   :  { %vm777_vm3 = vcmask 27657   ;;  %vm937_vm4 = vcmask 35857   ;;  %vm197_vm5 = vcmask 18432   ;;  %vm1227_vm6 = vcmask 28682  }
  0x14   :  { %vm1387_vm7 = vcmask 36882   ;;  %vm1097_vm8 = vcmask 20482  }
  0x16   :  { %282 = vperm.xlu1 %1591, %v1517_v11   ;;  %278 = vperm.xlu0 %1590, %v1516_v12  }
  0x1a   :  { %290 = vperm.xlu1 %1591, %v1519_v13   ;;  %286 = vperm.xlu0 %1590, %v1518_v14  }
  0x1e   :  { %298 = vperm.xlu1 %1591, %v1521_v15   ;;  %294 = vperm.xlu0 %1590, %v1520_v16   ;;  %v1816_v15 = vld [vmem:[%s2439_s0 + $0x18] sm:$0x1f] }
  0x22   :  { %306 = vperm.xlu1 %1591, %v1523_v17   ;;  %302 = vperm.xlu0 %1590, %v1522_v18  }
  0x26   :  { %438 = vperm.xlu1 %1591, %v1525_v19   ;;  %434 = vperm.xlu0 %1590, %v1524_v20  }
  0x2a   :  { %446 = vperm.xlu1 %1591, %v1527_v21   ;;  %442 = vperm.xlu0 %1590, %v1526_v22   ;;  %v1825_v22 = vld [vmem:[%s2439_s0 + $0x28] sm:$0x1f] }
  0x2e   :  { %454 = vperm.xlu1 %1591, %v1529_v23   ;;  %450 = vperm.xlu0 %1590, %v1528_v24  }
  0x32   :  { %462 = vperm.xlu1 %1591, %v1531_v25   ;;  %458 = vperm.xlu0 %1590, %v1530_v26  }
  0x36   :  { %594 = vperm.xlu1 %1591, %v1533_v27   ;;  %466 = vperm.xlu0 %1590, %v1532_v28  }
  0x3a   :  { %602 = vperm.xlu1 %1591, %v1535_v29   ;;  %598 = vperm.xlu0 %1590, %v1534_v30  }
  0x3e   :  { %610 = vperm.xlu1 %1591, %v1537_v31   ;;  %606 = vperm.xlu0 %1590, %v1536_v32  }
  0x42   :  { %618 = vperm.xlu1 %1591, %v1539_v33   ;;  %614 = vperm.xlu0 %1590, %v1538_v34  }
  0x46   :  { %626 = vperm.xlu1 %1591, %v1541_v35   ;;  %622 = vperm.xlu0 %1590, %v1540_v36  }
  0x4a   :  { %728 = vperm.xlu1 %1591, %v1543_v37   ;;  %724 = vperm.xlu0 %1590, %v1542_v38  }
  0x4e   :  { %736 = vperm.xlu1 %1591, %v1545_v39   ;;  %732 = vperm.xlu0 %1590, %v1544_v40  }
  0x52   :  { %744 = vperm.xlu1 %1591, %v1547_v41   ;;  %740 = vperm.xlu0 %1590, %v1546_v42  }
  0x56   :  { %752 = vperm.xlu1 %1591, %v1549_v43   ;;  %748 = vperm.xlu0 %1590, %v1548_v44  }
  0x5a   :  { %884 = vperm.xlu1 %1591, %v1551_v45   ;;  %756 = vperm.xlu0 %1590, %v1550_v46  }
  0x5e   :  { %892 = vperm.xlu1 %1591, %v1553_v47   ;;  %888 = vperm.xlu0 %1590, %v1552_v48  }
  0x62   :  { %900 = vperm.xlu1 %1591, %v1555_v49   ;;  %896 = vperm.xlu0 %1590, %v1554_v50  }
  0x7d   :  { %v1766_v51 = vpop.permute.xlu1 %152  ;;  %v1768_v52 = vpop.permute.xlu0 %144 }
  0x81   :  { %v1770_v53 = vpop.permute.xlu1 %156  ;;  %v1772_v54 = vpop.permute.xlu0 %148 }
  0x85   :  { %v1774_v55 = vpop.permute.xlu1 %164  ;;  %v1776_v56 = vpop.permute.xlu0 %160 }
  0x89   :  { %v1778_v57 = vpop.permute.xlu1 %172  ;;  %v1780_v58 = vpop.permute.xlu0 %168 }
  0x8d   :  { %v275_v59 = vpop.permute.xlu1 %274  ;;  %v1782_v60 = vpop.permute.xlu0 %176 }
  0x8e   :  { %v309_v62 = vmul.f32 %v275_v59, %v1787_v61  ;;  %v318_v17 = vmul.f32 %v275_v59, %v1816_v15 }
  0x90   :  { %v328_v5 = vsel %vm327_vm0, %v309_v62, 0.0  ;;  %v343_v28 = vsel %vm327_vm0, %v318_v17, 0.0 }
  0x91   :  { %v283_v1 = vpop.permute.xlu1 %282  ;;  %v279_v2 = vpop.permute.xlu0 %278 }
  0x92   :  { %v311_v3 = vmul.f32 %v283_v1, %v1793_v63  ;;  %v310_v4 = vmul.f32 %v279_v2, %v1798_v0  ;;  %v319_v11 = vmul.f32 %v279_v2, %v1807_v7  ;;  %v320_v25 = vmul.f32 %v283_v1, %v1825_v22 }
  0x94   :  { %v329_v6 = vsel %vm327_vm0, %v310_v4, 0.0  ;;  %v331_v14 = vsel %vm327_vm0, %v311_v3, 0.0  ;;  %v344_v23 = vsel %vm327_vm0, %v319_v11, 0.0  ;;  %v346_v42 = vsel %vm327_vm0, %v320_v25, 0.0 }
  0x95   :  { %v291_v8 = vpop.permute.xlu1 %290  ;;  %v287_v9 = vpop.permute.xlu0 %286  ;;  %v330_v10 = vadd.f32 %v329_v6, %v328_v5  ;;  %v345_v35 = vadd.f32 %v344_v23, %v343_v28 }
  0x96   :  { %v313_v12 = vmul.f32 %v291_v8, %v1798_v0  ;;  %v312_v13 = vmul.f32 %v287_v9, %v1787_v61  ;;  %v322_v31 = vmul.f32 %v291_v8, %v1807_v7  ;;  %v321_v36 = vmul.f32 %v287_v9, %v1816_v15 }
  0x97   :  { %v332_v16 = vadd.f32 %v331_v14, %v330_v10  ;;  %v347_v50 = vadd.f32 %v346_v42, %v345_v35 }
  0x98   :  { %v334_v18 = vsel %vm327_vm0, %v313_v12, 0.0  ;;  %v333_v19 = vsel %vm327_vm0, %v312_v13, 0.0  ;;  %v349_v47 = vsel %vm327_vm0, %v322_v31, 0.0  ;;  %v348_v1 = vsel %vm327_vm0, %v321_v36, 0.0 }
  0x99   :  { %v299_v20 = vpop.permute.xlu1 %298  ;;  %v295_v21 = vpop.permute.xlu0 %294  ;;  %364 = vrot.lane.b32.xlu0 %v332_v16, %s1599_s7  ;;  %v335_v27 = vadd.f32 %v334_v18, %v333_v19  ;;  %v350_v14 = vadd.f32 %v349_v47, %v348_v1 }
  0x9a   :  { %v314_v24 = vmul.f32 %v295_v21, %v1793_v63  ;;  %v315_v26 = vmul.f32 %v299_v20, %v1787_v61  ;;  %v324_v29 = vmul.f32 %v299_v20, %v1816_v15  ;;  %v323_v41 = vmul.f32 %v295_v21, %v1825_v22 }
  0x9c   :  { %v336_v30 = vsel %vm327_vm0, %v314_v24, 0.0  ;;  %v338_v40 = vsel %vm327_vm0, %v315_v26, 0.0  ;;  %v353_v43 = vsel %vm327_vm0, %v324_v29, 0.0  ;;  %v351_v10 = vsel %vm327_vm0, %v323_v41, 0.0 }
  0x9d   :  { %v307_v32 = vpop.permute.xlu1 %306  ;;  %v303_v33 = vpop.permute.xlu0 %302  ;;  %v337_v34 = vadd.f32 %v336_v30, %v335_v27  ;;  %v352_v18 = vadd.f32 %v351_v10, %v350_v14 }
  0x9e   :  { %v317_v37 = vmul.f32 %v307_v32, %v1793_v63  ;;  %v316_v38 = vmul.f32 %v303_v33, %v1798_v0  ;;  %v325_v39 = vmul.f32 %v303_v33, %v1807_v7  ;;  %v326_v44 = vmul.f32 %v307_v32, %v1825_v22 }
  0x9f   :  { %366 = vrot.lane.b32.xlu1 %v337_v34, %s1599_s7 }
  0xa0   :  { %v339_v45 = vsel %vm327_vm0, %v316_v38, 0.0  ;;  %v354_v46 = vsel %vm327_vm0, %v325_v39, 0.0  ;;  %v341_v4 = vsel %vm327_vm0, %v317_v37, 0.0  ;;  %v356_v9 = vsel %vm327_vm0, %v326_v44, 0.0 }
  0xa1   :  { %v439_v48 = vpop.permute.xlu1 %438  ;;  %v435_v49 = vpop.permute.xlu0 %434  ;;  %v340_v59 = vadd.f32 %v339_v45, %v338_v40  ;;  %v355_v62 = vadd.f32 %v354_v46, %v353_v43 }
  0xa2   :  { %v470_v2 = vmul.f32 %v439_v48, %v1798_v0  ;;  %v469_v3 = vmul.f32 %v435_v49, %v1787_v61  ;;  %v479_v17 = vmul.f32 %v439_v48, %v1807_v7  ;;  %v478_v23 = vmul.f32 %v435_v49, %v1816_v15 }
  0xa3   :  { %370 = vrot.lane.b32.xlu1 %v347_v50, %s1599_s7  ;;  %v342_v5 = vadd.f32 %v341_v4, %v340_v59  ;;  %v357_v13 = vadd.f32 %v356_v9, %v355_v62 }
  0xa4   :  { %v489_v6 = vsel %vm487_vm1, %v470_v2, 0.0  ;;  %v488_v8 = vsel %vm487_vm1, %v469_v3, 0.0  ;;  %v504_v29 = vsel %vm487_vm1, %v479_v17, 0.0  ;;  %v503_v34 = vsel %vm487_vm1, %v478_v23, 0.0 }
  0xa5   :  { %v447_v11 = vpop.permute.xlu1 %446  ;;  %v443_v12 = vpop.permute.xlu0 %442  ;;  %368 = vrot.lane.b32.xlu0 %v342_v5, %s1599_s7  ;;  %v490_v19 = vadd.f32 %v489_v6, %v488_v8  ;;  %v505_v1 = vadd.f32 %v504_v29, %v503_v34 }
  0xa6   :  { %v471_v16 = vmul.f32 %v443_v12, %v1793_v63  ;;  %v472_v20 = vmul.f32 %v447_v11, %v1787_v61  ;;  %v480_v31 = vmul.f32 %v443_v12, %v1825_v22  ;;  %v481_v35 = vmul.f32 %v447_v11, %v1816_v15 }
  0xa7   :  { %374 = vrot.lane.b32.xlu1 %v357_v13, %s1599_s7 }
  0xa8   :  { %v491_v21 = vsel %vm487_vm1, %v471_v16, 0.0  ;;  %v493_v30 = vsel %vm487_vm1, %v472_v20, 0.0  ;;  %v506_v45 = vsel %vm487_vm1, %v480_v31, 0.0  ;;  %v508_v49 = vsel %vm487_vm1, %v481_v35, 0.0 }
  0xa9   :  { %v455_v24 = vpop.permute.xlu1 %454  ;;  %v451_v25 = vpop.permute.xlu0 %450  ;;  %372 = vrot.lane.b32.xlu0 %v352_v18, %s1599_s7  ;;  %v492_v26 = vadd.f32 %v491_v21, %v490_v19  ;;  %v507_v9 = vadd.f32 %v506_v45, %v505_v1 }
  0xaa   :  { %v474_v27 = vmul.f32 %v455_v24, %v1793_v63  ;;  %v473_v28 = vmul.f32 %v451_v25, %v1798_v0  ;;  %v482_v32 = vmul.f32 %v451_v25, %v1807_v7  ;;  %v483_v50 = vmul.f32 %v455_v24, %v1825_v22 }
  0xab   :  { %524 = vrot.lane.b32.xlu1 %v492_v26, %s1600_s10 }
  0xac   :  { %v494_v33 = vsel %vm487_vm1, %v473_v28, 0.0  ;;  %v496_v36 = vsel %vm487_vm1, %v474_v27, 0.0  ;;  %v509_v46 = vsel %vm487_vm1, %v482_v32, 0.0  ;;  %v511_v14 = vsel %vm487_vm1, %v483_v50, 0.0 }
  0xad   :  { %v495_v37 = vadd.f32 %v494_v33, %v493_v30  ;;  %v463_v38 = vpop.permute.xlu1 %462  ;;  %v459_v39 = vpop.permute.xlu0 %458  ;;  %v510_v6 = vadd.f32 %v509_v46, %v508_v49 }
  0xae   :  { %v476_v40 = vmul.f32 %v463_v38, %v1798_v0  ;;  %v485_v41 = vmul.f32 %v463_v38, %v1807_v7  ;;  %v475_v42 = vmul.f32 %v459_v39, %v1787_v61  ;;  %v484_v43 = vmul.f32 %v459_v39, %v1816_v15 }
  0xaf   :  { %v497_v44 = vadd.f32 %v496_v36, %v495_v37  ;;  %v512_v26 = vadd.f32 %v511_v14, %v510_v6 }
  0xb0   :  { %v499_v47 = vsel %vm487_vm1, %v476_v40, 0.0  ;;  %v498_v48 = vsel %vm487_vm1, %v475_v42, 0.0  ;;  %v514_v2 = vsel %vm487_vm1, %v485_v41, 0.0  ;;  %v513_v3 = vsel %vm487_vm1, %v484_v43, 0.0 }
  0xb1   :  { %v595_v59 = vpop.permute.xlu1 %594  ;;  %v467_v62 = vpop.permute.xlu0 %466  ;;  %526 = vrot.lane.b32.xlu0 %v497_v44, %s1600_s10  ;;  %v500_v8 = vadd.f32 %v499_v47, %v498_v48  ;;  %v515_v16 = vadd.f32 %v514_v2, %v513_v3 }
  0xb2   :  { %v477_v4 = vmul.f32 %v467_v62, %v1793_v63  ;;  %v486_v5 = vmul.f32 %v467_v62, %v1825_v22  ;;  %v629_v10 = vmul.f32 %v595_v59, %v1787_v61  ;;  %v638_v11 = vmul.f32 %v595_v59, %v1816_v15 }
  0xb4   :  { %v501_v12 = vsel %vm487_vm1, %v477_v4, 0.0  ;;  %v516_v13 = vsel %vm487_vm1, %v486_v5, 0.0  ;;  %v648_v27 = vsel %vm647_vm2, %v629_v10, 0.0  ;;  %v663_v28 = vsel %vm647_vm2, %v638_v11, 0.0 }
  0xb5   :  { %v603_v17 = vpop.permute.xlu1 %602  ;;  %v599_v18 = vpop.permute.xlu0 %598  ;;  %530 = vrot.lane.b32.xlu0 %v507_v9, %s1600_s10  ;;  %v502_v19 = vadd.f32 %v501_v12, %v500_v8  ;;  %v517_v25 = vadd.f32 %v516_v13, %v515_v16 }
  0xb6   :  { %v631_v20 = vmul.f32 %v603_v17, %v1793_v63  ;;  %v640_v21 = vmul.f32 %v603_v17, %v1825_v22  ;;  %v630_v23 = vmul.f32 %v599_v18, %v1798_v0  ;;  %v639_v24 = vmul.f32 %v599_v18, %v1807_v7 }
  0xb7   :  { %528 = vrot.lane.b32.xlu1 %v502_v19, %s1600_s10 }
  0xb8   :  { %v649_v29 = vsel %vm647_vm2, %v630_v23, 0.0  ;;  %v664_v30 = vsel %vm647_vm2, %v639_v24, 0.0  ;;  %v651_v34 = vsel %vm647_vm2, %v631_v20, 0.0  ;;  %v666_v36 = vsel %vm647_vm2, %v640_v21, 0.0 }
  0xb9   :  { %v611_v31 = vpop.permute.xlu1 %610  ;;  %v607_v32 = vpop.permute.xlu0 %606  ;;  %534 = vrot.lane.b32.xlu0 %v517_v25, %s1600_s10  ;;  %v650_v33 = vadd.f32 %v649_v29, %v648_v27  ;;  %v665_v35 = vadd.f32 %v664_v30, %v663_v28 }
  0xba   :  { %v633_v37 = vmul.f32 %v611_v31, %v1798_v0  ;;  %v642_v38 = vmul.f32 %v611_v31, %v1807_v7  ;;  %v632_v39 = vmul.f32 %v607_v32, %v1787_v61  ;;  %v641_v40 = vmul.f32 %v607_v32, %v1816_v15 }
  0xbb   :  { %532 = vrot.lane.b32.xlu1 %v512_v26, %s1600_s10  ;;  %v1914_v41 = vadd.f32 %v651_v34, %v650_v33  ;;  %v1916_v42 = vadd.f32 %v666_v36, %v665_v35 }
  0xbc   :  { %v654_v43 = vsel %vm647_vm2, %v633_v37, 0.0  ;;  %v669_v44 = vsel %vm647_vm2, %v642_v38, 0.0  ;;  %v653_v45 = vsel %vm647_vm2, %v632_v39, 0.0  ;;  %v668_v46 = vsel %vm647_vm2, %v641_v40, 0.0 }
  0xbd   :  { %v619_v47 = vpop.permute.xlu1 %618  ;;  %v615_v48 = vpop.permute.xlu0 %614  ;;  %v655_v49 = vadd.f32 %v654_v43, %v653_v45  ;;  %v670_v50 = vadd.f32 %v669_v44, %v668_v46 }
  0xbe   :  { %v634_v59 = vmul.f32 %v615_v48, %v1793_v63  ;;  %v643_v62 = vmul.f32 %v615_v48, %v1825_v22  ;;  %v635_v1 = vmul.f32 %v619_v47, %v1787_v61  ;;  %v644_v2 = vmul.f32 %v619_v47, %v1816_v15 }
  0xc0   :  { %v656_v3 = vsel %vm647_vm2, %v634_v59, 0.0  ;;  %v671_v4 = vsel %vm647_vm2, %v643_v62, 0.0  ;;  %v658_v14 = vsel %vm647_vm2, %v635_v1, 0.0  ;;  %v673_v16 = vsel %vm647_vm2, %v644_v2, 0.0 }
  0xc1   :  { %v627_v5 = vpop.permute.xlu1 %626  ;;  %v623_v6 = vpop.permute.xlu0 %622  ;;  %v1928_v8 = vadd.f32 %v656_v3, %v655_v49  ;;  %v1930_v9 = vadd.f32 %v671_v4, %v670_v50 }
  0xc2   :  { %v637_v10 = vmul.f32 %v627_v5, %v1793_v63  ;;  %v646_v11 = vmul.f32 %v627_v5, %v1825_v22  ;;  %v636_v12 = vmul.f32 %v623_v6, %v1798_v0  ;;  %v645_v13 = vmul.f32 %v623_v6, %v1807_v7 }
  0xc4   :  { %v659_v17 = vsel %vm647_vm2, %v636_v12, 0.0  ;;  %v674_v18 = vsel %vm647_vm2, %v645_v13, 0.0  ;;  %v661_v26 = vsel %vm647_vm2, %v637_v10, 0.0  ;;  %v676_v27 = vsel %vm647_vm2, %v646_v11, 0.0 }
  0xc5   :  { %v729_v19 = vpop.permute.xlu1 %728  ;;  %v725_v20 = vpop.permute.xlu0 %724  ;;  %v660_v21 = vadd.f32 %v659_v17, %v658_v14  ;;  %v675_v23 = vadd.f32 %v674_v18, %v673_v16 }
  0xc6   :  { %v760_v24 = vmul.f32 %v729_v19, %v1798_v0  ;;  %v759_v25 = vmul.f32 %v725_v20, %v1787_v61  ;;  %v769_v36 = vmul.f32 %v729_v19, %v1807_v7  ;;  %v768_v39 = vmul.f32 %v725_v20, %v1816_v15 }
  0xc7   :  { %v1944_v28 = vadd.f32 %v661_v26, %v660_v21  ;;  %v1946_v29 = vadd.f32 %v676_v27, %v675_v23 }
  0xc8   :  { %v779_v30 = vsel %vm777_vm3, %v760_v24, 0.0  ;;  %v778_v31 = vsel %vm777_vm3, %v759_v25, 0.0  ;;  %v794_v47 = vsel %vm777_vm3, %v769_v36, 0.0  ;;  %v793_v59 = vsel %vm777_vm3, %v768_v39, 0.0 }
  0xc9   :  { %v737_v32 = vpop.permute.xlu1 %736  ;;  %v733_v33 = vpop.permute.xlu0 %732  ;;  %v780_v35 = vadd.f32 %v779_v30, %v778_v31  ;;  %v795_v18 = vadd.f32 %v794_v47, %v793_v59 }
  0xca   :  { %v761_v34 = vmul.f32 %v733_v33, %v1793_v63  ;;  %v762_v37 = vmul.f32 %v737_v32, %v1787_v61  ;;  %v770_v49 = vmul.f32 %v733_v33, %v1825_v22  ;;  %v771_v12 = vmul.f32 %v737_v32, %v1816_v15 }
  0xcc   :  { %v781_v38 = vsel %vm777_vm3, %v761_v34, 0.0  ;;  %v783_v48 = vsel %vm777_vm3, %v762_v37, 0.0  ;;  %v796_v14 = vsel %vm777_vm3, %v770_v49, 0.0  ;;  %v798_v27 = vsel %vm777_vm3, %v771_v12, 0.0 }
  0xcd   :  { %v745_v40 = vpop.permute.xlu1 %744  ;;  %v741_v43 = vpop.permute.xlu0 %740  ;;  %v782_v44 = vadd.f32 %v781_v38, %v780_v35  ;;  %v797_v31 = vadd.f32 %v796_v14, %v795_v18  ;;  %v1557_v14 = vld [vmem:[%s2438_s1 + $0x33] ss:$0 sm:$0xff] }
  0xce   :  { %v764_v45 = vmul.f32 %v745_v40, %v1793_v63  ;;  %v763_v46 = vmul.f32 %v741_v43, %v1798_v0  ;;  %v772_v1 = vmul.f32 %v741_v43, %v1807_v7  ;;  %v773_v32 = vmul.f32 %v745_v40, %v1825_v22 }
  0xcf   :  { %814 = vrot.lane.b32.xlu1 %v782_v44, %s1599_s7 }
  0xd0   :  { %v784_v50 = vsel %vm777_vm3, %v763_v46, 0.0  ;;  %v786_v62 = vsel %vm777_vm3, %v764_v45, 0.0  ;;  %v799_v19 = vsel %vm777_vm3, %v772_v1, 0.0  ;;  %v801_v46 = vsel %vm777_vm3, %v773_v32, 0.0 }
  0xd1   :  { %v785_v2 = vadd.f32 %v784_v50, %v783_v48  ;;  %v753_v3 = vpop.permute.xlu1 %752  ;;  %v749_v4 = vpop.permute.xlu0 %748  ;;  %v800_v36 = vadd.f32 %v799_v19, %v798_v27  ;;  %v1558_v19 = vld [vmem:[%s2438_s1 + $0x34] ss:$0 sm:$0xff]  ;;  %v183_v32 = vmul.f32 %v1776_v56, %v1798_v0 }
  0xd2   :  { %v766_v5 = vmul.f32 %v753_v3, %v1798_v0  ;;  %v775_v6 = vmul.f32 %v753_v3, %v1807_v7  ;;  %v765_v10 = vmul.f32 %v749_v4, %v1787_v61  ;;  %v774_v11 = vmul.f32 %v749_v4, %v1816_v15 }
  0xd3   :  { %v787_v13 = vadd.f32 %v786_v62, %v785_v2  ;;  %v802_v1 = vadd.f32 %v801_v46, %v800_v36 }
  0xd4   :  { %v789_v16 = vsel %vm777_vm3, %v766_v5, 0.0  ;;  %v788_v17 = vsel %vm777_vm3, %v765_v10, 0.0  ;;  %v804_v23 = vsel %vm777_vm3, %v775_v6, 0.0  ;;  %v803_v24 = vsel %vm777_vm3, %v774_v11, 0.0  ;;  %v1556_v6 = vld [vmem:[%s2438_s1 + $0x32] ss:$0 sm:$0xff] }
  0xd5   :  { %v885_v20 = vpop.permute.xlu1 %884  ;;  %v757_v21 = vpop.permute.xlu0 %756  ;;  %816 = vrot.lane.b32.xlu0 %v787_v13, %s1599_s7  ;;  %v790_v30 = vadd.f32 %v789_v16, %v788_v17  ;;  %v805_v37 = vadd.f32 %v804_v23, %v803_v24 }
  0xd6   :  { %v767_v25 = vmul.f32 %v757_v21, %v1793_v63  ;;  %v776_v26 = vmul.f32 %v757_v21, %v1825_v22  ;;  %v928_v33 = vmul.f32 %v885_v20, %v1816_v15  ;;  %v919_v2 = vmul.f32 %v885_v20, %v1787_v61  ;;  %v1559_v21 = vld [vmem:[%s2438_s1 + $0x35] ss:$0 sm:$0xff] }
  0xd8   :  { %v791_v34 = vsel %vm777_vm3, %v767_v25, 0.0  ;;  %v806_v35 = vsel %vm777_vm3, %v776_v26, 0.0  ;;  %v953_v47 = vsel %vm937_vm4, %v928_v33, 0.0  ;;  %v938_v17 = vsel %vm937_vm4, %v919_v2, 0.0 }
  0xd9   :  { %v893_v38 = vpop.permute.xlu1 %892  ;;  %v889_v39 = vpop.permute.xlu0 %888  ;;  %820 = vrot.lane.b32.xlu0 %v797_v31, %s1599_s7  ;;  %v792_v43 = vadd.f32 %v791_v34, %v790_v30  ;;  %v807_v40 = vadd.f32 %v806_v35, %v805_v37  ;;  %v180_v25 = vmul.f32 %v1772_v54, %v1798_v0  ;;  %v179_v26 = vmul.f32 %v1768_v52, %v1787_v61 }
  0xda   :  { %v930_v44 = vmul.f32 %v893_v38, %v1825_v22  ;;  %v929_v45 = vmul.f32 %v889_v39, %v1807_v7  ;;  %v920_v48 = vmul.f32 %v889_v39, %v1798_v0  ;;  %v921_v18 = vmul.f32 %v893_v38, %v1793_v63 }
  0xdb   :  { %818 = vrot.lane.b32.xlu1 %v792_v43, %s1599_s7  ;;  %v199_v30 = vsel %vm197_vm5, %v180_v25, 0.0  ;;  %v181_v31 = vmul.f32 %v1766_v51, %v1793_v63  ;;  %v198_v34 = vsel %vm197_vm5, %v179_v26, 0.0  ;;  %v182_v37 = vmul.f32 %v1770_v53, %v1787_v61 }
  0xdc   :  { %v954_v49 = vsel %vm937_vm4, %v929_v45, 0.0  ;;  %v956_v3 = vsel %vm937_vm4, %v930_v44, 0.0  ;;  %v939_v11 = vsel %vm937_vm4, %v920_v48, 0.0  ;;  %v941_v23 = vsel %vm937_vm4, %v921_v18, 0.0 }
  0xdd   :  { %v955_v50 = vadd.f32 %v954_v49, %v953_v47  ;;  %v1992_v59 = vpop.permute.xlu1 %900  ;;  %v1994_v62 = vpop.permute.xlu0 %896  ;;  %824 = vrot.lane.b32.xlu0 %v807_v40, %s1599_s7  ;;  %v940_v20 = vadd.f32 %v939_v11, %v938_v17  ;;  %v200_v36 = vadd.f32 %v199_v30, %v198_v34  ;;  %v189_v38 = vmul.f32 %v1772_v54, %v1807_v7 }
  0xde   :  { %v932_v4 = vmul.f32 %v1992_v59, %v1807_v7  ;;  %v931_v5 = vmul.f32 %v1994_v62, %v1816_v15  ;;  %v201_v39 = vsel %vm197_vm5, %v181_v31, 0.0  ;;  %v204_v43 = vsel %vm197_vm5, %v183_v32, 0.0 }
  0xdf   :  { %822 = vrot.lane.b32.xlu1 %v802_v1, %s1599_s7  ;;  %v2007_v10 = vadd.f32 %v956_v3, %v955_v50  ;;  %v942_v24 = vadd.f32 %v941_v23, %v940_v20  ;;  %v188_v40 = vmul.f32 %v1768_v52, %v1816_v15  ;;  %v202_v46 = vadd.f32 %v201_v39, %v200_v36 }
  0xe0   :  { %v959_v12 = vsel %vm937_vm4, %v932_v4, 0.0  ;;  %v958_v13 = vsel %vm937_vm4, %v931_v5, 0.0  ;;  %v184_v47 = vmul.f32 %v1774_v55, %v1793_v63  ;;  %v203_v48 = vsel %vm197_vm5, %v182_v37, 0.0 }
  0xe1   :  { %v2015_v16 = vadd.f32 %v959_v12, %v958_v13  ;;  %904 = vperm.xlu0 %1590, %v1556_v6   ;;  %v205_v50 = vadd.f32 %v204_v43, %v203_v48  ;;  %v186_v54 = vmul.f32 %v1778_v57, %v1798_v0  ;;  %v185_v1 = vmul.f32 %v1780_v58, %v1787_v61 }
  0xe2   :  { %v214_v2 = vsel %vm197_vm5, %v189_v38, 0.0  ;;  %v190_v52 = vmul.f32 %v1766_v51, %v1825_v22  ;;  %v192_v4 = vmul.f32 %v1776_v56, %v1807_v7  ;;  %v213_v5 = vsel %vm197_vm5, %v188_v40, 0.0 }
  0xe3   :  { %908 = vperm.xlu1 %1591, %v1557_v14   ;;  %v195_v11 = vmul.f32 %v1778_v57, %v1807_v7  ;;  %v194_v12 = vmul.f32 %v1780_v58, %v1816_v15  ;;  %v187_v13 = vmul.f32 %v1782_v60, %v1793_v63  ;;  %v206_v14 = vsel %vm197_vm5, %v184_v47, 0.0 }
  0xe4   :  { %v207_v51 = vadd.f32 %v206_v14, %v205_v50  ;;  %v215_v18 = vadd.f32 %v214_v2, %v213_v5  ;;  %v191_v56 = vmul.f32 %v1770_v53, %v1816_v15  ;;  %v209_v20 = vsel %vm197_vm5, %v186_v54, 0.0 }
  0xe5   :  { %912 = vperm.xlu0 %1590, %v1558_v19   ;;  %v196_v19 = vmul.f32 %v1782_v60, %v1825_v22  ;;  %v208_v57 = vsel %vm197_vm5, %v185_v1, 0.0  ;;  %v216_v58 = vsel %vm197_vm5, %v190_v52, 0.0  ;;  %v211_v23 = vsel %vm197_vm5, %v187_v13, 0.0 }
  0xe6   :  { %v224_v25 = vsel %vm197_vm5, %v195_v11, 0.0  ;;  %v219_v26 = vsel %vm197_vm5, %v192_v4, 0.0  ;;  %v217_v53 = vadd.f32 %v216_v58, %v215_v18  ;;  %v210_v31 = vadd.f32 %v209_v20, %v208_v57 }
  0xe7   :  { %916 = vperm.xlu1 %1591, %v1559_v21   ;;  %v193_v60 = vmul.f32 %v1774_v55, %v1825_v22 }
  0xe8   :  { %v212_v36 = vadd.f32 %v211_v23, %v210_v31 }
  0xe9   :  { %974 = vrot.lane.b32.xlu0 %v942_v24, %s1600_s10  ;;  %v223_v24 = vsel %vm197_vm5, %v194_v12, 0.0  ;;  %v221_v47 = vsel %vm197_vm5, %v193_v60, 0.0 }
  0xea   :  { %v225_v37 = vadd.f32 %v224_v25, %v223_v24 }
 0x10b   :  { %v365_v33 = vpop.permute.xlu0 %364 }
 0x10c   :  { %v382_v49 = vadd.f32 %v365_v33, %v202_v46  ;;  %v218_v33 = vsel %vm197_vm5, %v191_v56, 0.0 }
 0x10d   :  { %v220_v38 = vadd.f32 %v219_v26, %v218_v33  ;;  %v1570_v33 = vld [vmem:[%s2438_s1 + $0x40] ss:$0 sm:$0xff] }
 0x10f   :  { %v222_v50 = vadd.f32 %v221_v47, %v220_v38  ;;  %v1575_v38 = vld [vmem:[%s2438_s1 + $0x45] ss:$0 sm:$0xff]  ;;  %v1577_v47 = vld [vmem:[%s2438_s1 + $0x47] ss:$0 sm:$0xff] }
 0x111   :  { %v367_v27 = vpop.permute.xlu1 %366 }
 0x112   :  { %v383_v21 = vadd.f32 %v367_v27, %v207_v51  ;;  %v226_v27 = vsel %vm197_vm5, %v196_v19, 0.0 }
 0x113   :  { %v227_v40 = vadd.f32 %v226_v27, %v225_v37  ;;  %v1572_v37 = vld [vmem:[%s2438_s1 + $0x42] ss:$0 sm:$0xff] }
 0x115   :  { %v371_v35 = vpop.permute.xlu1 %370 }
 0x116   :  { %v385_v34 = vadd.f32 %v371_v35, %v217_v53 }
 0x117   :  { %v369_v44 = vpop.permute.xlu0 %368 }
 0x118   :  { %v384_v43 = vadd.f32 %v369_v44, %v212_v36  ;;  %v1569_v36 = vld [vmem:[%s2438_s1 + $0x3f] ss:$0 sm:$0xff] }
 0x119   :  { %v375_v45 = vpop.permute.xlu1 %374 }
 0x11b   :  { %v373_v17 = vpop.permute.xlu0 %372 }
 0x11c   :  { %v386_v1 = vadd.f32 %v373_v17, %v222_v50  ;;  %v1584_v50 = vld [vmem:[%s2438_s1 + $0x4e] ss:$0 sm:$0xff] }
 0x11d   :  { %v525_v3 = vpop.permute.xlu1 %524 }
 0x11e   :  { %v2058_v6 = vadd.f32 %v525_v3, %v382_v49  ;;  %v387_v49 = vadd.f32 %v375_v45, %v227_v40  ;;  %v1578_v40 = vld [vmem:[%s2438_s1 + $0x48] ss:$0 sm:$0xff] }
 0x123   :  { %v527_v30 = vpop.permute.xlu0 %526 }
 0x124   :  { %v2078_v32 = vadd.f32 %v527_v30, %v383_v21 }
 0x127   :  { %v531_v39 = vpop.permute.xlu0 %530 }
 0x128   :  { %v2084_v46 = vadd.f32 %v531_v39, %v385_v34  ;;  %v1574_v39 = vld [vmem:[%s2438_s1 + $0x44] ss:$0 sm:$0xff] }
 0x129   :  { %v529_v48 = vpop.permute.xlu1 %528 }
 0x12a   :  { %v2087_v54 = vadd.f32 %v529_v48, %v384_v43  ;;  %v1571_v43 = vld [vmem:[%s2438_s1 + $0x41] ss:$0 sm:$0xff]  ;;  %v1581_v48 = vld [vmem:[%s2438_s1 + $0x4b] ss:$0 sm:$0xff] }
 0x12b   :  { %v535_v55 = vpop.permute.xlu0 %534 }
 0x12c   :  { %v2089_v2 = vadd.f32 %v535_v55, %v387_v49  ;;  %v1579_v49 = vld [vmem:[%s2438_s1 + $0x49] ss:$0 sm:$0xff]  ;;  %v1582_v55 = vld [vmem:[%s2438_s1 + $0x4c] ss:$0 sm:$0xff] }
 0x12d   :  { %v533_v35 = vpop.permute.xlu1 %532 }
 0x12e   :  { %v2091_v3 = vadd.f32 %v533_v35, %v386_v1  ;;  %v1580_v1 = vld [vmem:[%s2438_s1 + $0x4a] ss:$0 sm:$0xff]  ;;  %v1585_v35 = vld [vmem:[%s2438_s1 + $0x4f] ss:$0 sm:$0xff] }
 0x141   :  { %v815_v52 = vpop.permute.xlu1 %814 }
 0x142   :  { %v832_v44 = vadd.f32 %v815_v52, %v1914_v41  ;;  %v923_v41 = vmul.f32 %v1992_v59, %v1798_v0  ;;  %v1586_v52 = vld [vmem:[%s2438_s1 + $0x50] ss:$0 sm:$0xff] }
 0x147   :  { %v817_v4 = vpop.permute.xlu0 %816 }
 0x148   :  { %v2095_v5 = vadd.f32 %v817_v4, %v1928_v8  ;;  %v922_v8 = vmul.f32 %v1994_v62, %v1787_v61  ;;  %v1561_v4 = vld [vmem:[%s2438_s1 + $0x37] ss:$0 sm:$0xff] }
 0x14a   :  { %v943_v56 = vsel %vm937_vm4, %v922_v8, 0.0  ;;  %v1566_v8 = vld [vmem:[%s2438_s1 + $0x3c] ss:$0 sm:$0xff] }
 0x14b   :  { %v821_v11 = vpop.permute.xlu0 %820 }
 0x14c   :  { %v2098_v45 = vadd.f32 %v821_v11, %v1916_v42  ;;  %v944_v42 = vsel %vm937_vm4, %v923_v41, 0.0  ;;  %v1560_v11 = vld [vmem:[%s2438_s1 + $0x36] ss:$0 sm:$0xff] }
 0x14d   :  { %v819_v12 = vpop.permute.xlu1 %818  ;;  %v945_v19 = vadd.f32 %v944_v42, %v943_v56  ;;  %v1565_v56 = vld [vmem:[%s2438_s1 + $0x3b] ss:$0 sm:$0xff] }
 0x14e   :  { %v2101_v13 = vadd.f32 %v819_v12, %v1944_v28  ;;  %v1564_v12 = vld [vmem:[%s2438_s1 + $0x3a] ss:$0 sm:$0xff] }
 0x14f   :  { %v825_v14 = vpop.permute.xlu0 %824 }
 0x150   :  { %v2104_v17 = vadd.f32 %v825_v14, %v1946_v29  ;;  %v1563_v14 = vld [vmem:[%s2438_s1 + $0x39] ss:$0 sm:$0xff] }
 0x151   :  { %v823_v51 = vpop.permute.xlu1 %822 }
 0x152   :  { %v2107_v18 = vadd.f32 %v823_v51, %v1930_v9  ;;  %v1567_v51 = vld [vmem:[%s2438_s1 + $0x3d] ss:$0 sm:$0xff] }
 0x15c   :  { %v2115_v28 = vpop.permute.xlu0 %904 }
 0x15d   :  { %v924_v29 = vmul.f32 %v2115_v28, %v1793_v63  ;;  %v933_v41 = vmul.f32 %v2115_v28, %v1825_v22  ;;  %v1562_v28 = vld [vmem:[%s2438_s1 + $0x38] ss:$0 sm:$0xff] }
 0x15e   :  { %v2119_v20 = vpop.permute.xlu1 %908 }
 0x15f   :  { %v946_v9 = vsel %vm937_vm4, %v924_v29, 0.0  ;;  %v925_v59 = vmul.f32 %v2119_v20, %v1787_v61  ;;  %v961_v29 = vsel %vm937_vm4, %v933_v41, 0.0 }
 0x160   :  { %v2124_v57 = vpop.permute.xlu0 %912  ;;  %v947_v62 = vadd.f32 %v946_v9, %v945_v19  ;;  %v934_v19 = vmul.f32 %v2119_v20, %v1816_v15 }
 0x161   :  { %v926_v21 = vmul.f32 %v2124_v57, %v1798_v0  ;;  %v948_v23 = vsel %vm937_vm4, %v925_v59, 0.0  ;;  %v935_v42 = vmul.f32 %v2124_v57, %v1807_v7  ;;  %v962_v57 = vadd.f32 %v961_v29, %v2015_v16 }
 0x162   :  { %v2128_v58 = vpop.permute.xlu1 %916  ;;  %976 = vrot.lane.b32.xlu1 %v947_v62, %s1600_s10  ;;  %v963_v62 = vsel %vm937_vm4, %v934_v19, 0.0 }
 0x163   :  { %v949_v24 = vsel %vm937_vm4, %v926_v21, 0.0  ;;  %v927_v25 = vmul.f32 %v2128_v58, %v1793_v63  ;;  %v964_v9 = vsel %vm937_vm4, %v935_v42, 0.0  ;;  %v936_v59 = vmul.f32 %v2128_v58, %v1825_v22  ;;  %v1568_v21 = vld [vmem:[%s2438_s1 + $0x3e] ss:$0 sm:$0xff] }
 0x164   :  { %v950_v26 = vadd.f32 %v949_v24, %v948_v23  ;;  %v975_v30 = vpop.permute.xlu0 %974  ;;  %v965_v20 = vadd.f32 %v964_v9, %v963_v62 }
 0x165   :  { %v951_v53 = vsel %vm937_vm4, %v927_v25, 0.0  ;;  %v992_v31 = vadd.f32 %v975_v30, %v832_v44  ;;  %v1583_v44 = vld [vmem:[%s2438_s1 + $0x4d] ss:$0 sm:$0xff]  ;;  %v966_v23 = vsel %vm937_vm4, %v936_v59, 0.0 }
 0x166   :  { %980 = vrot.lane.b32.xlu1 %v2007_v10, %s1600_s10  ;;  %v952_v60 = vadd.f32 %v951_v53, %v950_v26  ;;  %v1573_v10 = vld [vmem:[%s2438_s1 + $0x43] ss:$0 sm:$0xff]  ;;  %v967_v24 = vadd.f32 %v966_v23, %v965_v20  ;;  %v2282_v23 = vld [vmem:[%s2439_s0 + $0x10] sm:$0x1f] }
 0x167   :  { %v1454_v27 = vrot.slane %v992_v31, 1 }
 0x168   :  { %978 = vrot.lane.b32.xlu0 %v952_v60, %s1600_s10 }
 0x169   :  { %v2143_v34 = vadd.f32 %v1454_v27, %v2058_v6  ;;  %v1576_v6 = vld [vmem:[%s2438_s1 + $0x46] ss:$0 sm:$0xff] }
 0x16a   :  { %1178 = vperm.xlu1 %1591, %v1570_v33  }
 0x16c   :  { %1174 = vperm.xlu0 %1590, %v1569_v36  }
 0x16e   :  { %1190 = vperm.xlu1 %1591, %v1573_v10  }
 0x170   :  { %1186 = vperm.xlu0 %1590, %v1572_v37  }
 0x172   :  { %1202 = vperm.xlu1 %1591, %v1576_v6  }
 0x174   :  { %1198 = vperm.xlu0 %1590, %v1575_v38  }
 0x176   :  { %1194 = vperm.xlu1 %1591, %v1574_v39  }
 0x178   :  { %1182 = vperm.xlu0 %1590, %v1571_v43  }
 0x17a   :  { %1334 = vperm.xlu1 %1591, %v1578_v40  }
 0x17c   :  { %1206 = vperm.xlu0 %1590, %v1577_v47  }
 0x17e   :  { %1346 = vperm.xlu1 %1591, %v1581_v48  }
 0x180   :  { %1338 = vperm.xlu0 %1590, %v1579_v49  }
 0x182   :  { %1358 = vperm.xlu1 %1591, %v1584_v50  }
 0x184   :  { %1350 = vperm.xlu0 %1590, %v1582_v55  }
 0x186   :  { %1342 = vperm.xlu1 %1591, %v1580_v1  }
 0x188   :  { %1362 = vperm.xlu0 %1590, %v1585_v35  }
 0x18a   :  { %1366 = vperm.xlu1 %1591, %v1586_v52  }
 0x18c   :  { %1354 = vperm.xlu0 %1590, %v1583_v44  }
 0x18e   :  { %1048 = vperm.xlu1 %1591, %v1561_v4  }
 0x190   :  { %1044 = vperm.xlu0 %1590, %v1560_v11  }
 0x192   :  { %1060 = vperm.xlu1 %1591, %v1564_v12  }
 0x194   :  { %1056 = vperm.xlu0 %1590, %v1563_v14  }
 0x196   :  { %1072 = vperm.xlu1 %1591, %v1567_v51  }
 0x198   :  { %1068 = vperm.xlu0 %1590, %v1566_v8  }
 0x19a   :  { %1064 = vperm.xlu1 %1591, %v1565_v56  }
 0x19c   :  { %1052 = vperm.xlu0 %1590, %v1562_v28  }
 0x19e   :  { %982 = vrot.lane.b32.xlu1 %v962_v57, %s1600_s10 }
 0x1a0   :  { %1076 = vperm.xlu0 %1590, %v1568_v21  }
 0x1a4   :  { %984 = vrot.lane.b32.xlu0 %v967_v24, %s1600_s10 }
 0x1d4   :  { %v977_v25 = vpop.permute.xlu1 %976 }
 0x1d5   :  { %v993_v58 = vadd.f32 %v977_v25, %v2095_v5 }
 0x1d7   :  { %v1455_v16 = vrot.slane %v993_v58, 1 }
 0x1d8   :  { %v981_v26 = vpop.permute.xlu1 %980 }
 0x1d9   :  { %v2240_v30 = vadd.f32 %v1455_v16, %v2078_v32  ;;  %v995_v53 = vadd.f32 %v981_v26, %v2098_v45 }
 0x1da   :  { %v979_v31 = vpop.permute.xlu0 %978 }
 0x1db   :  { %v1457_v60 = vrot.slane %v995_v53, 1  ;;  %v994_v27 = vadd.f32 %v979_v31, %v2101_v13 }
 0x1dd   :  { %v2245_v33 = vadd.f32 %v1457_v60, %v2084_v46  ;;  %v1456_v36 = vrot.slane %v994_v27, 1 }
 0x1df   :  { %v2248_v10 = vadd.f32 %v1456_v36, %v2087_v54 }
 0x1e5   :  { %v1179_v37 = vpop.permute.xlu1 %1178 }
 0x1e6   :  { %v1210_v13 = vmul.f32 %v1179_v37, %v1798_v0  ;;  %v1219_v47 = vmul.f32 %v1179_v37, %v1807_v7 }
 0x1e7   :  { %v1175_v5 = vpop.permute.xlu0 %1174 }
 0x1e8   :  { %v1209_v45 = vmul.f32 %v1175_v5, %v1787_v61  ;;  %v1218_v46 = vmul.f32 %v1175_v5, %v1816_v15  ;;  %v1229_v35 = vsel %vm1227_vm6, %v1210_v13, 0.0 }
 0x1e9   :  { %v1191_v6 = vpop.permute.xlu1 %1190 }
 0x1ea   :  { %v1213_v43 = vmul.f32 %v1191_v6, %v1798_v0  ;;  %v1228_v49 = vsel %vm1227_vm6, %v1209_v45, 0.0  ;;  %v1243_v52 = vsel %vm1227_vm6, %v1218_v46, 0.0 }
 0x1eb   :  { %v1187_v38 = vpop.permute.xlu0 %1186  ;;  %v1230_v8 = vadd.f32 %v1229_v35, %v1228_v49 }
 0x1ec   :  { %v1212_v32 = vmul.f32 %v1187_v38, %v1787_v61  ;;  %v1234_v50 = vsel %vm1227_vm6, %v1213_v43, 0.0  ;;  %v1221_v42 = vmul.f32 %v1187_v38, %v1816_v15  ;;  %v2304_v43 = vld [vmem:[%s2439_s0] sm:$0x1f] }
 0x1ed   :  { %v1203_v39 = vpop.permute.xlu1 %1202 }
 0x1ee   :  { %v1233_v54 = vsel %vm1227_vm6, %v1212_v32, 0.0  ;;  %v1216_v4 = vmul.f32 %v1203_v39, %v1798_v0  ;;  %v1225_v19 = vmul.f32 %v1203_v39, %v1807_v7  ;;  %v1248_v26 = vsel %vm1227_vm6, %v1221_v42, 0.0 }
 0x1ef   :  { %v1199_v40 = vpop.permute.xlu0 %1198  ;;  %v1235_v44 = vadd.f32 %v1234_v50, %v1233_v54 }
 0x1f0   :  { %v1215_v55 = vmul.f32 %v1199_v40, %v1787_v61  ;;  %v1224_v12 = vmul.f32 %v1199_v40, %v1816_v15  ;;  %v1244_v61 = vsel %vm1227_vm6, %v1219_v47, 0.0  ;;  %v1239_v57 = vsel %vm1227_vm6, %v1216_v4, 0.0 }
 0x1f1   :  { %v1195_v48 = vpop.permute.xlu1 %1194  ;;  %v1245_v59 = vadd.f32 %v1244_v61, %v1243_v52  ;;  %v1254_v53 = vsel %vm1227_vm6, %v1225_v19, 0.0  ;;  %v2318_v52 = vld [vmem:[%s2439_s0 + $0x20] sm:$0x1f] }
 0x1f2   :  { %v1214_v1 = vmul.f32 %v1195_v48, %v1793_v63  ;;  %v1238_v0 = vsel %vm1227_vm6, %v1215_v55, 0.0  ;;  %v1253_v15 = vsel %vm1227_vm6, %v1224_v12, 0.0  ;;  %v1223_v20 = vmul.f32 %v1195_v48, %v1825_v22 }
 0x1f3   :  { %v1183_v11 = vpop.permute.xlu0 %1182  ;;  %v1255_v27 = vadd.f32 %v1254_v53, %v1253_v15 }
 0x1f4   :  { %v1236_v14 = vsel %vm1227_vm6, %v1214_v1, 0.0  ;;  %v1211_v51 = vmul.f32 %v1183_v11, %v1793_v63  ;;  %v1220_v41 = vmul.f32 %v1183_v11, %v1825_v22  ;;  %v1222_v63 = vmul.f32 %v1191_v6, %v1807_v7  ;;  %v2297_v6 = vld [vmem:[%s2439_s0 + $0x8] sm:$0x1f] }
 0x1f5   :  { %v1237_v56 = vadd.f32 %v1236_v14, %v1235_v44  ;;  %v1335_v29 = vpop.permute.xlu1 %1334  ;;  %v1240_v7 = vadd.f32 %v1239_v57, %v1238_v0  ;;  %v1251_v5 = vsel %vm1227_vm6, %v1223_v20, 0.0  ;;  %v2326_v14 = vld [vmem:[%s2439_s0 + $0x18] sm:$0x1f] }
 0x1f6   :  { %v1231_v28 = vsel %vm1227_vm6, %v1211_v51, 0.0  ;;  %v1246_v9 = vsel %vm1227_vm6, %v1220_v41, 0.0  ;;  %v1369_v13 = vmul.f32 %v2304_v43, %v1335_v29  ;;  %v1378_v51 = vmul.f32 %v2326_v14, %v1335_v29  ;;  %v2340_v29 = vld [vmem:[%s2439_s0 + $0x28] sm:$0x1f] }
 0x1f7   :  { %v1232_v62 = vadd.f32 %v1231_v28, %v1230_v8  ;;  %1266 = vrot.lane.b32.xlu0 %v1237_v56, %s1599_s7  ;;  %v1207_v21 = vpop.permute.xlu0 %1206  ;;  %v1247_v58 = vadd.f32 %v1246_v9, %v1245_v59 }
 0x1f8   :  { %v1217_v24 = vmul.f32 %v2282_v23, %v1207_v21  ;;  %v1226_v25 = vmul.f32 %v1207_v21, %v1825_v22  ;;  %v1249_v22 = vsel %vm1227_vm6, %v1222_v63, 0.0  ;;  %v1388_v48 = vsel %vm1387_vm7, %v1369_v13, 0.0 }
 0x1f9   :  { %v1347_v16 = vpop.permute.xlu1 %1346  ;;  %1264 = vrot.lane.b32.xlu1 %v1232_v62, %s1599_s7  ;;  %v1250_v32 = vadd.f32 %v1249_v22, %v1248_v26  ;;  %v1403_v22 = vsel %vm1387_vm7, %v1378_v51, 0.0 }
 0x1fa   :  { %v1241_v31 = vsel %vm1227_vm6, %v1217_v24, 0.0  ;;  %v1256_v60 = vsel %vm1227_vm6, %v1226_v25, 0.0  ;;  %v1372_v1 = vmul.f32 %v2304_v43, %v1347_v16  ;;  %v1381_v41 = vmul.f32 %v2326_v14, %v1347_v16 }
 0x1fb   :  { %v1242_v36 = vadd.f32 %v1241_v31, %v1240_v7  ;;  %1270 = vrot.lane.b32.xlu0 %v1247_v58, %s1599_s7  ;;  %v1339_v37 = vpop.permute.xlu0 %1338  ;;  %v1257_v39 = vadd.f32 %v1256_v60, %v1255_v27  ;;  %v1252_v46 = vadd.f32 %v1251_v5, %v1250_v32 }
 0x1fc   :  { %v1370_v38 = vmul.f32 %v2297_v6, %v1339_v37  ;;  %v1379_v61 = vmul.f32 %v2318_v52, %v1339_v37  ;;  %v1393_v9 = vsel %vm1387_vm7, %v1372_v1, 0.0  ;;  %v1408_v25 = vsel %vm1387_vm7, %v1381_v41, 0.0 }
 0x1fd   :  { %v1359_v45 = vpop.permute.xlu1 %1358  ;;  %1268 = vrot.lane.b32.xlu1 %v1242_v36, %s1599_s7 }
 0x1fe   :  { %v1389_v54 = vsel %vm1387_vm7, %v1370_v38, 0.0  ;;  %v1375_v49 = vmul.f32 %v2304_v43, %v1359_v45  ;;  %v1404_v26 = vsel %vm1387_vm7, %v1379_v61, 0.0  ;;  %v1384_v53 = vmul.f32 %v2326_v14, %v1359_v45 }
 0x1ff   :  { %1274 = vrot.lane.b32.xlu0 %v1257_v39, %s1599_s7  ;;  %v1351_v40 = vpop.permute.xlu0 %1350  ;;  %v1390_v35 = vadd.f32 %v1389_v54, %v1388_v48  ;;  %v1405_v39 = vadd.f32 %v1404_v26, %v1403_v22 }
 0x200   :  { %v1373_v50 = vmul.f32 %v2297_v6, %v1351_v40  ;;  %v1382_v44 = vmul.f32 %v2318_v52, %v1351_v40  ;;  %v1398_v56 = vsel %vm1387_vm7, %v1375_v49, 0.0 }
 0x201   :  { %v1343_v47 = vpop.permute.xlu1 %1342  ;;  %1272 = vrot.lane.b32.xlu1 %v1252_v46, %s1599_s7  ;;  %v1413_v46 = vsel %vm1387_vm7, %v1384_v53, 0.0 }
 0x202   :  { %v1371_v55 = vmul.f32 %v2282_v23, %v1343_v47  ;;  %v1394_v19 = vsel %vm1387_vm7, %v1373_v50, 0.0  ;;  %v1409_v59 = vsel %vm1387_vm7, %v1382_v44, 0.0  ;;  %v1380_v63 = vmul.f32 %v2340_v29, %v1343_v47 }
 0x203   :  { %v1363_v4 = vpop.permute.xlu0 %1362  ;;  %v1395_v7 = vadd.f32 %v1394_v19, %v1393_v9  ;;  %v1410_v27 = vadd.f32 %v1409_v59, %v1408_v25 }
 0x204   :  { %v1391_v11 = vsel %vm1387_vm7, %v1371_v55, 0.0  ;;  %v1376_v12 = vmul.f32 %v2297_v6, %v1363_v4  ;;  %v1385_v21 = vmul.f32 %v2318_v52, %v1363_v4  ;;  %v1406_v5 = vsel %vm1387_vm7, %v1380_v63, 0.0 }
 0x205   :  { %v1392_v8 = vadd.f32 %v1391_v11, %v1390_v35  ;;  %v1367_v42 = vpop.permute.xlu1 %1366  ;;  %v1407_v40 = vadd.f32 %v1406_v5, %v1405_v39 }
 0x206   :  { %v1399_v0 = vsel %vm1387_vm7, %v1376_v12, 0.0  ;;  %v1377_v28 = vmul.f32 %v2282_v23, %v1367_v42  ;;  %v1414_v38 = vsel %vm1387_vm7, %v1385_v21, 0.0  ;;  %v1386_v32 = vmul.f32 %v2340_v29, %v1367_v42 }
 0x207   :  { %v1400_v57 = vadd.f32 %v1399_v0, %v1398_v56  ;;  %1424 = vrot.lane.b32.xlu1 %v1392_v8, %s1600_s10  ;;  %v1355_v62 = vpop.permute.xlu0 %1354  ;;  %v1415_v54 = vadd.f32 %v1414_v38, %v1413_v46 }
 0x208   :  { %v1401_v15 = vsel %vm1387_vm7, %v1377_v28, 0.0  ;;  %v1374_v20 = vmul.f32 %v2282_v23, %v1355_v62  ;;  %v1383_v24 = vmul.f32 %v2340_v29, %v1355_v62  ;;  %v1416_v48 = vsel %vm1387_vm7, %v1386_v32, 0.0 }
 0x209   :  { %v1402_v58 = vadd.f32 %v1401_v15, %v1400_v57  ;;  %v1049_v16 = vpop.permute.xlu1 %1048  ;;  %v1417_v50 = vadd.f32 %v1416_v48, %v1415_v54 }
 0x20a   :  { %v1396_v31 = vsel %vm1387_vm7, %v1374_v20, 0.0  ;;  %v1411_v60 = vsel %vm1387_vm7, %v1383_v24, 0.0  ;;  %v1080_v0 = vmul.f32 %v2297_v6, %v1049_v16  ;;  %v1089_v26 = vmul.f32 %v2318_v52, %v1049_v16 }
 0x20b   :  { %v1397_v36 = vadd.f32 %v1396_v31, %v1395_v7  ;;  %1428 = vrot.lane.b32.xlu1 %v1402_v58, %s1600_s10  ;;  %v1045_v37 = vpop.permute.xlu0 %1044  ;;  %v1412_v13 = vadd.f32 %v1411_v60, %v1410_v27 }
 0x20c   :  { %v1079_v19 = vmul.f32 %v2304_v43, %v1045_v37  ;;  %v1114_v54 = vsel %vm1097_vm8, %v1089_v26, 0.0 }
 0x20d   :  { %v1061_v45 = vpop.permute.xlu1 %1060  ;;  %1426 = vrot.lane.b32.xlu0 %v1397_v36, %s1600_s10 }
 0x20e   :  { %v1083_v21 = vmul.f32 %v2297_v6, %v1061_v45  ;;  %v1092_v53 = vmul.f32 %v2318_v52, %v1061_v45 }
 0x20f   :  { %1432 = vrot.lane.b32.xlu1 %v1412_v13, %s1600_s10  ;;  %v1057_v47 = vpop.permute.xlu0 %1056 }
 0x210   :  { %v1082_v63 = vmul.f32 %v2304_v43, %v1057_v47  ;;  %v1091_v20 = vmul.f32 %v2326_v14, %v1057_v47  ;;  %v1104_v22 = vsel %vm1097_vm8, %v1083_v21, 0.0  ;;  %v1119_v47 = vsel %vm1097_vm8, %v1092_v53, 0.0 }
 0x211   :  { %v1073_v49 = vpop.permute.xlu1 %1072  ;;  %1430 = vrot.lane.b32.xlu0 %v1407_v40, %s1600_s10 }
 0x212   :  { %v1103_v60 = vsel %vm1097_vm8, %v1082_v63, 0.0  ;;  %v1118_v38 = vsel %vm1097_vm8, %v1091_v20, 0.0  ;;  %v1095_v48 = vmul.f32 %v2318_v52, %v1073_v49 }
 0x213   :  { %v1069_v55 = vpop.permute.xlu0 %1068  ;;  %v1105_v45 = vadd.f32 %v1104_v22, %v1103_v60 }
 0x214   :  { %v1085_v59 = vmul.f32 %v2304_v43, %v1069_v55  ;;  %v1088_v43 = vmul.f32 %v2326_v14, %v1045_v37  ;;  %v1094_v16 = vmul.f32 %v2326_v14, %v1069_v55 }
 0x215   :  { %v1065_v1 = vpop.permute.xlu1 %1064  ;;  %1434 = vrot.lane.b32.xlu0 %v1417_v50, %s1600_s10 }
 0x216   :  { %v1108_v24 = vsel %vm1097_vm8, %v1085_v59, 0.0  ;;  %v1084_v25 = vmul.f32 %v2282_v23, %v1065_v1  ;;  %v1093_v27 = vmul.f32 %v2340_v29, %v1065_v1  ;;  %v1113_v13 = vsel %vm1097_vm8, %v1088_v43, 0.0 }
 0x217   :  { %v1053_v35 = vpop.permute.xlu0 %1052 }
 0x218   :  { %v1090_v37 = vmul.f32 %v2340_v29, %v1053_v35  ;;  %v1106_v32 = vsel %vm1097_vm8, %v1084_v25, 0.0  ;;  %v1121_v1 = vsel %vm1097_vm8, %v1093_v27, 0.0 }
 0x219   :  { %v983_v44 = vpop.permute.xlu1 %982  ;;  %v1107_v14 = vadd.f32 %v1106_v32, %v1105_v45 }
 0x21a   :  { %v996_v4 = vadd.f32 %v983_v44, %v2107_v18  ;;  %v1081_v18 = vmul.f32 %v2282_v23, %v1053_v35  ;;  %v1120_v35 = vadd.f32 %v1119_v47, %v1118_v38 }
 0x21b   :  { %v1077_v11 = vpop.permute.xlu0 %1076 }
 0x21c   :  { %v1458_v12 = vrot.slane %v996_v4, 1  ;;  %v1087_v57 = vmul.f32 %v2282_v23, %v1077_v11  ;;  %v1101_v62 = vsel %vm1097_vm8, %v1081_v18, 0.0  ;;  %v1123_v4 = vsel %vm1097_vm8, %v1094_v16, 0.0 }
 0x21e   :  { %v2366_v51 = vadd.f32 %v1458_v12, %v2091_v3  ;;  %v1098_v3 = vsel %vm1097_vm8, %v1079_v19, 0.0  ;;  %v1111_v36 = vsel %vm1097_vm8, %v1087_v57, 0.0  ;;  %v1096_v12 = vmul.f32 %v2340_v29, %v1077_v11 }
 0x21f   :  { %v985_v41 = vpop.permute.xlu0 %984  ;;  %v1122_v19 = vadd.f32 %v1121_v1, %v1120_v35 }
 0x220   :  { %v997_v61 = vadd.f32 %v985_v41, %v2104_v17  ;;  %v1099_v17 = vsel %vm1097_vm8, %v1080_v0, 0.0  ;;  %v1115_v41 = vadd.f32 %v1114_v54, %v1113_v13 }
 0x221   :  { %v1100_v15 = vadd.f32 %v1099_v17, %v1098_v3  ;;  %v1126_v17 = vsel %vm1097_vm8, %v1096_v12, 0.0 }
 0x222   :  { %v1459_v8 = vrot.slane %v997_v61, 1  ;;  %v1116_v61 = vsel %vm1097_vm8, %v1090_v37, 0.0 }
 0x223   :  { %v1102_v31 = vadd.f32 %v1101_v62, %v1100_v15  ;;  %v1117_v3 = vadd.f32 %v1116_v61, %v1115_v41 }
 0x224   :  { %v2370_v42 = vadd.f32 %v1459_v8, %v2089_v2  ;;  %v1086_v2 = vmul.f32 %v2297_v6, %v1073_v49  ;;  %v1124_v49 = vsel %vm1097_vm8, %v1095_v48, 0.0 }
 0x225   :  { %v1125_v59 = vadd.f32 %v1124_v49, %v1123_v4 }
 0x226   :  { %v1109_v6 = vsel %vm1097_vm8, %v1086_v2, 0.0 }
 0x227   :  { %v1110_v5 = vadd.f32 %v1109_v6, %v1108_v24  ;;  %v1127_v21 = vadd.f32 %v1126_v17, %v1125_v59 }
 0x229   :  { %v1112_v46 = vadd.f32 %v1111_v36, %v1110_v5 }
 0x269   :  { %v1267_v28 = vpop.permute.xlu0 %1266 }
 0x26b   :  { %v1265_v56 = vpop.permute.xlu1 %1264 }
 0x26c   :  { %v1282_v23 = vadd.f32 %v1265_v56, %v1102_v31  ;;  %v1283_v56 = vadd.f32 %v1267_v28, %v1107_v14 }
 0x26d   :  { %v1271_v7 = vpop.permute.xlu0 %1270 }
 0x26e   :  { %v1285_v63 = vadd.f32 %v1271_v7, %v1117_v3 }
 0x26f   :  { %v1269_v9 = vpop.permute.xlu1 %1268 }
 0x270   :  { %v1284_v55 = vadd.f32 %v1269_v9, %v1112_v46 }
 0x271   :  { %v1275_v50 = vpop.permute.xlu0 %1274 }
 0x272   :  { %v1287_v25 = vadd.f32 %v1275_v50, %v1127_v21 }
 0x273   :  { %v1273_v58 = vpop.permute.xlu1 %1272 }
 0x274   :  { %v1286_v9 = vadd.f32 %v1273_v58, %v1122_v19 }
 0x279   :  { %v1425_v39 = vpop.permute.xlu1 %1424 }
 0x27a   :  { %v1442_v40 = vadd.f32 %v1425_v39, %v1282_v23 }
 0x27c   :  { %v1478_v44 = vrot.slane %v1442_v40, 2 }
 0x27d   :  { %v1429_v8 = vpop.permute.xlu1 %1428 }
 0x27e   :  { %v1490_v0 = vadd.f32 %v1478_v44, %v2143_v34  ;;  %v1444_v52 = vadd.f32 %v1429_v8, %v1284_v55 }
 0x27f   :  { %v1427_v18 = vpop.permute.xlu0 %1426 }
 0x280   :  { %1496 = vst.msk [vmem:[%s2440_s2] sm:$0x7] %vm197_vm5, %v1490_v0  ;;  %v1480_v29 = vrot.slane %v1444_v52, 2  ;;  %v1443_v11 = vadd.f32 %v1427_v18, %v1283_v56 }
 0x281   :  { %v1433_v28 = vpop.permute.xlu1 %1432 }
 0x282   :  { %v1492_v34 = vadd.f32 %v1480_v29, %v2248_v10  ;;  %v1479_v2 = vrot.slane %v1443_v11, 2  ;;  %v1446_v57 = vadd.f32 %v1433_v28, %v1286_v9 }
 0x283   :  { %v1431_v62 = vpop.permute.xlu0 %1430 }
 0x284   :  { %1498 = vst.msk [vmem:[%s2440_s2 + $0x8] sm:$0x7] %vm197_vm5, %v1492_v34  ;;  %v1491_v15 = vadd.f32 %v1479_v2, %v2240_v30  ;;  %v1482_v20 = vrot.slane %v1446_v57, 2  ;;  %v1445_v24 = vadd.f32 %v1431_v62, %v1285_v63 }
 0x286   :  { %1497 = vst.msk [vmem:[%s2440_s2 + $0x4] sm:$0x7] %vm197_vm5, %v1491_v15  ;;  %v1494_v10 = vadd.f32 %v1482_v20, %v2366_v51  ;;  %v1481_v7 = vrot.slane %v1445_v24, 2 }
 0x287   :  { %v1435_v58 = vpop.permute.xlu0 %1434 }
 0x288   :  { %1500 = vst.msk [vmem:[%s2440_s2 + $0x10] sm:$0x7] %vm197_vm5, %v1494_v10  ;;  %v1493_v26 = vadd.f32 %v1481_v7, %v2245_v33  ;;  %v1447_v30 = vadd.f32 %v1435_v58, %v1287_v25 }
 0x28a   :  { %1499 = vst.msk [vmem:[%s2440_s2 + $0xc] sm:$0x7] %vm197_vm5, %v1493_v26  ;;  %v1483_v43 = vrot.slane %v1447_v30, 2 }
 0x28c   :  { %v1495_v53 = vadd.f32 %v1483_v43, %v2370_v42 }
 0x28e   :  { %1501 = vst.msk [vmem:[%s2440_s2 + $0x14] sm:$0x7] %vm197_vm5, %v1495_v53 }

</bundles_post_ra>
